<compile_context>
chip_gen: v7x
topology: tpu7x:2x2x1
jax: 0.10.0
libtpu: 0.0.40
codegen_flags: <defaults>
</compile_context>

<pallas_src>
import functools

import jax
import jax.numpy as jnp
from jax.experimental import pallas as pl
from jax.experimental.pallas import tpu as pltpu

LANES = 128  # vreg lane width (last dim)


def _cdiv(a, b):
    return -(-a // b)


def _sublane_align(dtype) -> int:
    """Minimum row-block multiple for a dtype ((8|16|32, 128) min tiles)."""
    itemsize = jnp.dtype(dtype).itemsize
    if itemsize >= 4:
        return 8
    if itemsize == 2:
        return 16
    return 32


def _vmem_capacity_bytes() -> int:
    try:
        cap = getattr(pltpu.get_tpu_info(), "vmem_capacity_bytes", None)
        if cap:
            return int(cap)
    except Exception:
        pass
    return 64 * 1024 * 1024  # conservative default (v7x per-core VMEM)


def _dice_partial_kernel(logit_ref, truth_ref, inter_ref, union_ref, *,
                         n_valid, row_block):
    """Accumulate intersection / union partial sums for one (row_block, 128) tile.

    Grid is (num_splits, steps); each split owns one (1, 8, 128) output block that
    stays resident in VMEM across the inner reduction axis (accumulator pattern).
    """
    c = pl.program_id(0)
    j = pl.program_id(1)
    steps = pl.num_programs(1)

    @pl.when(j == 0)
    def _():
        inter_ref[...] = jnp.zeros_like(inter_ref)
        union_ref[...] = jnp.zeros_like(union_ref)

    x = logit_ref[...].astype(jnp.float32)
    t = truth_ref[...].astype(jnp.float32)
    # sigmoid(x) == 0.5 * (tanh(x/2) + 1): tanh runs on the EUP slot, so the only
    # per-element VPU work is a couple of mul/adds (no f32 divide).
    prob = 0.5 * jnp.tanh(0.5 * x) + 0.5

    def fold(v):
        # (row_block, 128) -> (row_block//8, 8, 128), sum over axis 0: per-step
        # folding stays pure VPU vreg adds (keeps (8,128) tiles intact); the single
        # cross-lane reduce happens once in the wrapper.
        return jnp.sum(v.reshape(row_block // 8, 8, LANES), axis=0)

    # Logical (un-clamped) block index.  The index_map clamps the duplicated block
    # that appears when the block count is odd; the mask below zeroes it entirely,
    # so every element is counted exactly once.
    start_row = (c * steps + j) * row_block
    last_full = n_valid // LANES   # number of fully-valid rows (static)
    rem = n_valid % LANES          # valid lanes of the partial row (static)

    ragged = (start_row + row_block) > last_full

    @pl.when(jnp.logical_not(ragged))
    def _():
        inter_ref[0] += fold(prob * t)
        union_ref[0] += fold(prob + t)

    @pl.when(ragged)
    def _():
        row_ids = start_row + jax.lax.broadcasted_iota(
            jnp.int32, (row_block, 1), 0)
        valid = row_ids < last_full
        if rem:
            lane_ids = jax.lax.broadcasted_iota(jnp.int32, (1, LANES), 1)
            valid = valid | ((row_ids == last_full) & (lane_ids < rem))
        zero = jnp.float32(0.0)
        inter_ref[0] += fold(jnp.where(valid, prob * t, zero))
        union_ref[0] += fold(jnp.where(valid, prob + t, zero))


def dice_loss(logit, truth, smooth=1.0):
    """Pallas equivalent of DiceLoss.forward(logit, truth); returns an f32 scalar."""
    assert logit.shape == truth.shape
    n = int(logit.size)
    assert n > 0

    lf = logit.reshape(-1)
    tf = truth.reshape(-1)

    # Dtype-aware row alignment so bf16 / int8 inputs satisfy packed-tile minimums
    # without any caller-side upcast (the f32 cast happens in-kernel).
    align = max(_sublane_align(logit.dtype), _sublane_align(truth.dtype))

    # Generation-aware sizing: 8192-row operand tiles (4 MiB f32) everywhere; only
    # the scoped-VMEM limit differs (v7x has 64 MiB physical VMEM per core).
    if _vmem_capacity_bytes() >= 96 * 1024 * 1024:   # v5e / v6e (128 MiB VMEM)
        target_rows, vmem_limit = 8192, 64 * 1024 * 1024
    else:                                            # v7x (64 MiB VMEM)
        target_rows, vmem_limit = 8192, 48 * 1024 * 1024

    rows = max(_cdiv(n, LANES), align)
    padded_len = rows * LANES
    if padded_len != n:
        # Only reached when n % 128 != 0 or the input is tiny (< `align` rows).
        # The in-kernel mask makes the pad value irrelevant, so pad with zeros.
        # Every n that is a multiple of 128 takes the copy-free reshape regardless
        # of row_block divisibility (the mask handles ragged blocks).
        # TODO(synk): a fully copy-free sub-128 tail would need 1-D blocks or a
        # manual-DMA gather of the remainder; not worth it for this loss.
        lf = jnp.pad(lf, (0, padded_len - n))
        tf = jnp.pad(tf, (0, padded_len - n))

    logit2d = lf.reshape(rows, LANES)
    truth2d = tf.reshape(rows, LANES)

    row_block = min(target_rows, (rows // align) * align)
    blocks_total = _cdiv(rows, row_block)
    # Two contiguous row ranges -> the "parallel" grid axis maps one to each
    # TensorCore on v7x (sequential, same total work, on single-core chips).
    num_splits = 2 if blocks_total >= 2 else 1
    steps = _cdiv(blocks_total, num_splits)

    def in_map(c, j):
        # Clamp the single duplicated block that appears when blocks_total is odd;
        # the kernel masks it out entirely.
        return (jnp.minimum(c * steps + j, blocks_total - 1), 0)

    kernel = functools.partial(
        _dice_partial_kernel, n_valid=n, row_block=row_block)

    inter_p, union_p = pl.pallas_call(
        kernel,
        out_shape=(
            jax.ShapeDtypeStruct((num_splits, 8, LANES), jnp.float32),
            jax.ShapeDtypeStruct((num_splits, 8, LANES), jnp.float32),
        ),
        grid_spec=pltpu.PrefetchScalarGridSpec(
            num_scalar_prefetch=0,
            grid=(num_splits, steps),
            in_specs=[
                pl.BlockSpec((row_block, LANES), in_map),
                pl.BlockSpec((row_block, LANES), in_map),
            ],
            out_specs=(
                pl.BlockSpec((1, 8, LANES), lambda c, j: (c, 0, 0)),
                pl.BlockSpec((1, 8, LANES), lambda c, j: (c, 0, 0)),
            ),
        ),
        compiler_params=pltpu.CompilerParams(
            dimension_semantics=("parallel", "arbitrary"),
            vmem_limit_bytes=vmem_limit,
        ),
    )(logit2d, truth2d)

    inter = jnp.sum(inter_p)
    union = jnp.sum(union_p)
    s = jnp.float32(smooth)
    return 1.0 - (2.0 * inter + s) / (union + s)


def _dice_loss_ref(logit, truth, smooth=1.0):
    prob = jax.nn.sigmoid(logit.astype(jnp.float32))
    t = truth.astype(jnp.float32)
    inter = jnp.sum(prob * t)
    union = jnp.sum(prob + t)
    return 1.0 - (2.0 * inter + smooth) / (union + smooth)


if __name__ == "__main__":
    key = jax.random.PRNGKey(0)
    k1, k2 = jax.random.split(key)

    # Small NCHW segmentation shapes: batch=2, channels=4, spatial=16x16.
    logit = jax.random.normal(k1, (2, 4, 16, 16), dtype=jnp.float32)
    truth = (jax.random.uniform(k2, (2, 4, 16, 16)) > 0.5).astype(jnp.float32)
    out = dice_loss(logit, truth)
    jax.block_until_ready(out)
    ref = _dice_loss_ref(logit, truth)
    assert jnp.allclose(out, ref, atol=1e-5, rtol=1e-5), (out, ref)

    # n % 128 == 0 but rows not a multiple of the row block: exercises the
    # copy-free 2-split grid with an in-kernel-masked ragged block, plus a
    # bf16-logit / f32-mask mixed-dtype input (no caller-side upcast).
    logit_b = jax.random.normal(k1, (4, 5, 128), dtype=jnp.bfloat16)
    truth_b = (jax.random.uniform(k2, (4, 5, 128)) > 0.5).astype(jnp.float32)
    out_b = dice_loss(logit_b, truth_b)
    jax.block_until_ready(out_b)
    ref_b = _dice_loss_ref(logit_b, truth_b)
    assert jnp.allclose(out_b, ref_b, atol=1e-4, rtol=1e-4), (out_b, ref_b)

    # Non-multiple-of-128 size: exercises the (rare) zero-pad + mask tail path.
    logit_odd = jax.random.normal(k1, (3, 5, 7), dtype=jnp.float32)
    truth_odd = (jax.random.uniform(k2, (3, 5, 7)) > 0.5).astype(jnp.float32)
    out_odd = dice_loss(logit_odd, truth_odd)
    jax.block_until_ready(out_odd)
    ref_odd = _dice_loss_ref(logit_odd, truth_odd)
    assert jnp.allclose(out_odd, ref_odd, atol=1e-5, rtol=1e-5), (out_odd, ref_odd)

    print("KERNEL_OK")
</pallas_src>

<mosaic_0001>
module attributes {stable_mosaic.version = 11 : i64} {
  func.func @_dice_partial_kernel(%arg0: i32, %arg1: i32, %arg2: memref<16x128xf32, #tpu.memory_space<vmem>>, %arg3: memref<16x128xf32, #tpu.memory_space<vmem>>, %arg4: memref<1x8x128xf32, #tpu.memory_space<vmem>>, %arg5: memref<1x8x128xf32, #tpu.memory_space<vmem>>) attributes {dimension_semantics = [#tpu.dimension_semantics<parallel>, #tpu.dimension_semantics<arbitrary>], iteration_bounds = array<i64: 1, 1>, scalar_prefetch = 0 : i64, scratch_operands = 0 : i64, tpu.core_type = #tpu.core_type<tc>, window_params = [{transform_indices = @transform_0, window_bounds = array<i64: 16, 128>}, {transform_indices = @transform_1, window_bounds = array<i64: 16, 128>}, {transform_indices = @transform_2, window_bounds = array<i64: 1, 8, 128>}, {transform_indices = @transform_3, window_bounds = array<i64: 1, 8, 128>}]} {
    %c0_i32 = arith.constant 0 : i32
    %0 = arith.cmpi eq, %arg1, %c0_i32 : i32
    %1 = arith.extui %0 : i1 to i32
    %c0_i32_0 = arith.constant 0 : i32
    %2 = arith.cmpi ne, %1, %c0_i32_0 : i32
    scf.if %2 {
      %cst_10 = arith.constant 0.000000e+00 : f32
      %22 = vector.broadcast %cst_10 : f32 to vector<1x8x128xf32>
      %c0_11 = arith.constant 0 : index
      %c0_12 = arith.constant 0 : index
      %c0_13 = arith.constant 0 : index
      %23 = vector.load %arg4[%c0_11, %c0_12, %c0_13] : memref<1x8x128xf32, #tpu.memory_space<vmem>>, vector<1x8x128xf32>
      tpu.vector_store %arg4[%c0_11, %c0_12, %c0_13], %22 {strides = array<i32>} : memref<1x8x128xf32, #tpu.memory_space<vmem>>, vector<1x8x128xf32>,
      %cst_14 = arith.constant 0.000000e+00 : f32
      %24 = vector.broadcast %cst_14 : f32 to vector<1x8x128xf32>
      %c0_15 = arith.constant 0 : index
      %c0_16 = arith.constant 0 : index
      %c0_17 = arith.constant 0 : index
      %25 = vector.load %arg5[%c0_15, %c0_16, %c0_17] : memref<1x8x128xf32, #tpu.memory_space<vmem>>, vector<1x8x128xf32>
      tpu.vector_store %arg5[%c0_15, %c0_16, %c0_17], %24 {strides = array<i32>} : memref<1x8x128xf32, #tpu.memory_space<vmem>>, vector<1x8x128xf32>,
    } else {
    }
    %c0 = arith.constant 0 : index
    %c0_1 = arith.constant 0 : index
    %3 = vector.load %arg2[%c0, %c0_1] : memref<16x128xf32, #tpu.memory_space<vmem>>, vector<16x128xf32>
    %c0_2 = arith.constant 0 : index
    %c0_3 = arith.constant 0 : index
    %4 = vector.load %arg3[%c0_2, %c0_3] : memref<16x128xf32, #tpu.memory_space<vmem>>, vector<16x128xf32>
    %cst = arith.constant 5.000000e-01 : f32
    %5 = vector.broadcast %cst : f32 to vector<16x128xf32>
    %6 = arith.mulf %5, %3 : vector<16x128xf32>
    %7 = math.tanh %6 : vector<16x128xf32>
    %cst_4 = arith.constant 5.000000e-01 : f32
    %8 = vector.broadcast %cst_4 : f32 to vector<16x128xf32>
    %9 = arith.mulf %8, %7 : vector<16x128xf32>
    %cst_5 = arith.constant 5.000000e-01 : f32
    %10 = vector.broadcast %cst_5 : f32 to vector<16x128xf32>
    %11 = arith.addf %9, %10 : vector<16x128xf32>
    %c1_i32 = arith.constant 1 : i32
    %12 = arith.muli %arg0, %c1_i32 : i32
    %13 = arith.addi %12, %arg1 : i32
    %c16_i32 = arith.constant 16 : i32
    %14 = arith.muli %13, %c16_i32 : i32
    %c16_i32_6 = arith.constant 16 : i32
    %15 = arith.addi %14, %c16_i32_6 : i32
    %c16_i32_7 = arith.constant 16 : i32
    %16 = arith.cmpi sgt, %15, %c16_i32_7 : i32
    %true = arith.constant true
    %17 = arith.xori %16, %true : i1
    %18 = arith.extui %17 : i1 to i32
    %c0_i32_8 = arith.constant 0 : i32
    %19 = arith.cmpi ne, %18, %c0_i32_8 : i32
    scf.if %19 {
      %c0_10 = arith.constant 0 : index
      %c0_11 = arith.constant 0 : index
      %c0_12 = arith.constant 0 : index
      %22 = vector.load %arg4[%c0_10, %c0_11, %c0_12] : memref<1x8x128xf32, #tpu.memory_space<vmem>>, vector<1x8x128xf32>
      %23 = vector.shape_cast %22 : vector<1x8x128xf32> to vector<8x128xf32>
      %24 = arith.mulf %11, %4 : vector<16x128xf32>
      %25 = vector.shape_cast %24 : vector<16x128xf32> to vector<2x8x128xf32>
      %cst_13 = arith.constant dense<0.000000e+00> : vector<8x128xf32>
      %26 = vector.multi_reduction <add>, %25, %cst_13 [0] : vector<2x8x128xf32> to vector<8x128xf32>
      %27 = arith.addf %23, %26 : vector<8x128xf32>
      %c0_14 = arith.constant 0 : index
      %c0_15 = arith.constant 0 : index
      %c0_16 = arith.constant 0 : index
      %28 = vector.load %arg4[%c0_14, %c0_15, %c0_16] : memref<1x8x128xf32, #tpu.memory_space<vmem>>, vector<1x8x128xf32>
      %29 = vector.shape_cast %28 : vector<1x8x128xf32> to vector<8x128xf32>
      %30 = vector.shape_cast %27 : vector<8x128xf32> to vector<1x8x128xf32>
      tpu.vector_store %arg4[%c0_14, %c0_15, %c0_16], %30 {strides = array<i32>} : memref<1x8x128xf32, #tpu.memory_space<vmem>>, vector<1x8x128xf32>,
      %c0_17 = arith.constant 0 : index
      %c0_18 = arith.constant 0 : index
      %c0_19 = arith.constant 0 : index
      %31 = vector.load %arg5[%c0_17, %c0_18, %c0_19] : memref<1x8x128xf32, #tpu.memory_space<vmem>>, vector<1x8x128xf32>
      %32 = vector.shape_cast %31 : vector<1x8x128xf32> to vector<8x128xf32>
      %33 = arith.addf %11, %4 : vector<16x128xf32>
      %34 = vector.shape_cast %33 : vector<16x128xf32> to vector<2x8x128xf32>
      %cst_20 = arith.constant dense<0.000000e+00> : vector<8x128xf32>
      %35 = vector.multi_reduction <add>, %34, %cst_20 [0] : vector<2x8x128xf32> to vector<8x128xf32>
      %36 = arith.addf %32, %35 : vector<8x128xf32>
      %c0_21 = arith.constant 0 : index
      %c0_22 = arith.constant 0 : index
      %c0_23 = arith.constant 0 : index
      %37 = vector.load %arg5[%c0_21, %c0_22, %c0_23] : memref<1x8x128xf32, #tpu.memory_space<vmem>>, vector<1x8x128xf32>
      %38 = vector.shape_cast %37 : vector<1x8x128xf32> to vector<8x128xf32>
      %39 = vector.shape_cast %36 : vector<8x128xf32> to vector<1x8x128xf32>
      tpu.vector_store %arg5[%c0_21, %c0_22, %c0_23], %39 {strides = array<i32>} : memref<1x8x128xf32, #tpu.memory_space<vmem>>, vector<1x8x128xf32>,
    } else {
    }
    %20 = arith.extui %16 : i1 to i32
    %c0_i32_9 = arith.constant 0 : i32
    %21 = arith.cmpi ne, %20, %c0_i32_9 : i32
    scf.if %21 {
      %22 = tpu.iota {dimensions = array<i32: 0>} : vector<16x1xi32>
      %23 = vector.broadcast %14 : i32 to vector<16x1xi32>
      %24 = arith.addi %23, %22 : vector<16x1xi32>
      %c16_i32_10 = arith.constant 16 : i32
      %25 = vector.broadcast %c16_i32_10 : i32 to vector<16x1xi32>
      %26 = arith.cmpi slt, %24, %25 : vector<16x1xi32>
      %c0_11 = arith.constant 0 : index
      %c0_12 = arith.constant 0 : index
      %c0_13 = arith.constant 0 : index
      %27 = vector.load %arg4[%c0_11, %c0_12, %c0_13] : memref<1x8x128xf32, #tpu.memory_space<vmem>>, vector<1x8x128xf32>
      %28 = vector.shape_cast %27 : vector<1x8x128xf32> to vector<8x128xf32>
      %29 = arith.mulf %11, %4 : vector<16x128xf32>
      %cst_14 = arith.constant 0.000000e+00 : f32
      %30 = vector.shape_cast %26 : vector<16x1xi1> to vector<16x1xi1>
      %31 = vector.broadcast %30 : vector<16x1xi1> to vector<16x128xi1>
      %32 = vector.broadcast %cst_14 : f32 to vector<16x128xf32>
      %33 = arith.select %31, %29, %32 : vector<16x128xi1>, vector<16x128xf32>
      %34 = vector.shape_cast %33 : vector<16x128xf32> to vector<2x8x128xf32>
      %cst_15 = arith.constant dense<0.000000e+00> : vector<8x128xf32>
      %35 = vector.multi_reduction <add>, %34, %cst_15 [0] : vector<2x8x128xf32> to vector<8x128xf32>
      %36 = arith.addf %28, %35 : vector<8x128xf32>
      %c0_16 = arith.constant 0 : index
      %c0_17 = arith.constant 0 : index
      %c0_18 = arith.constant 0 : index
      %37 = vector.load %arg4[%c0_16, %c0_17, %c0_18] : memref<1x8x128xf32, #tpu.memory_space<vmem>>, vector<1x8x128xf32>
      %38 = vector.shape_cast %37 : vector<1x8x128xf32> to vector<8x128xf32>
      %39 = vector.shape_cast %36 : vector<8x128xf32> to vector<1x8x128xf32>
      tpu.vector_store %arg4[%c0_16, %c0_17, %c0_18], %39 {strides = array<i32>} : memref<1x8x128xf32, #tpu.memory_space<vmem>>, vector<1x8x128xf32>,
      %c0_19 = arith.constant 0 : index
      %c0_20 = arith.constant 0 : index
      %c0_21 = arith.constant 0 : index
      %40 = vector.load %arg5[%c0_19, %c0_20, %c0_21] : memref<1x8x128xf32, #tpu.memory_space<vmem>>, vector<1x8x128xf32>
      %41 = vector.shape_cast %40 : vector<1x8x128xf32> to vector<8x128xf32>
      %42 = arith.addf %11, %4 : vector<16x128xf32>
      %cst_22 = arith.constant 0.000000e+00 : f32
      %43 = vector.shape_cast %26 : vector<16x1xi1> to vector<16x1xi1>
      %44 = vector.broadcast %43 : vector<16x1xi1> to vector<16x128xi1>
      %45 = vector.broadcast %cst_22 : f32 to vector<16x128xf32>
      %46 = arith.select %44, %42, %45 : vector<16x128xi1>, vector<16x128xf32>
      %47 = vector.shape_cast %46 : vector<16x128xf32> to vector<2x8x128xf32>
      %cst_23 = arith.constant dense<0.000000e+00> : vector<8x128xf32>
      %48 = vector.multi_reduction <add>, %47, %cst_23 [0] : vector<2x8x128xf32> to vector<8x128xf32>
      %49 = arith.addf %41, %48 : vector<8x128xf32>
      %c0_24 = arith.constant 0 : index
      %c0_25 = arith.constant 0 : index
      %c0_26 = arith.constant 0 : index
      %50 = vector.load %arg5[%c0_24, %c0_25, %c0_26] : memref<1x8x128xf32, #tpu.memory_space<vmem>>, vector<1x8x128xf32>
      %51 = vector.shape_cast %50 : vector<1x8x128xf32> to vector<8x128xf32>
      %52 = vector.shape_cast %49 : vector<8x128xf32> to vector<1x8x128xf32>
      tpu.vector_store %arg5[%c0_24, %c0_25, %c0_26], %52 {strides = array<i32>} : memref<1x8x128xf32, #tpu.memory_space<vmem>>, vector<1x8x128xf32>,
    } else {
    }
    return
  }
  func.func @transform_0(%arg0: i32, %arg1: i32) -> (i32, i32) {
    %c1_i32 = arith.constant 1 : i32
    %0 = arith.muli %arg0, %c1_i32 : i32
    %1 = arith.addi %0, %arg1 : i32
    %c0_i32 = arith.constant 0 : i32
    %2 = arith.minsi %1, %c0_i32 : i32
    %c0_i32_0 = arith.constant 0 : i32
    %c0_i32_1 = arith.constant 0 : i32
    return %2, %c0_i32_0 : i32, i32
  }
  func.func @transform_1(%arg0: i32, %arg1: i32) -> (i32, i32) {
    %c1_i32 = arith.constant 1 : i32
    %0 = arith.muli %arg0, %c1_i32 : i32
    %1 = arith.addi %0, %arg1 : i32
    %c0_i32 = arith.constant 0 : i32
    %2 = arith.minsi %1, %c0_i32 : i32
    %c0_i32_0 = arith.constant 0 : i32
    %c0_i32_1 = arith.constant 0 : i32
    return %2, %c0_i32_0 : i32, i32
  }
  func.func @transform_2(%arg0: i32, %arg1: i32) -> (i32, i32, i32) {
    %c0_i32 = arith.constant 0 : i32
    %c0_i32_0 = arith.constant 0 : i32
    %c0_i32_1 = arith.constant 0 : i32
    return %arg0, %c0_i32, %c0_i32_0 : i32, i32, i32
  }
  func.func @transform_3(%arg0: i32, %arg1: i32) -> (i32, i32, i32) {
    %c0_i32 = arith.constant 0 : i32
    %c0_i32_0 = arith.constant 0 : i32
    %c0_i32_1 = arith.constant 0 : i32
    return %arg0, %c0_i32, %c0_i32_0 : i32, i32, i32
  }
}

</mosaic_0001>

<bundles_post_ra>
// kernel: tpu_custom_call.1
= control target key start
LH: loop header
LB: loop body
LE: loop exit
PB: predicated region body
PF: predicated region fallthrough
CT: control target
= control target key end

     0   :  { %9 = vsyncpa [#allocation3], 0  ;;  %s347_s0 = inlined_call_operand.hbm [shape: f32[16,128], index: 0, kind: input, shape index: {}]   ;;  %s348_s1 = inlined_call_operand.hbm [shape: f32[16,128], index: 1, kind: input, shape index: {}]   ;;  %s349_s2 = inlined_call_operand.hbm [shape: f32[1,8,128], index: 2, kind: output, shape index: {0}]   ;;  %s350_s3 = inlined_call_operand.hbm [shape: f32[1,8,128], index: 3, kind: output, shape index: {1}]  }
   0x1   :  { %10 = vsyncpa [#allocation6], 0 }
   0x2   :  { %11 = vsyncpa [#allocation4], 0 }
   0x3   :  { %12 = vsyncpa [#allocation9], 0  ;;  %s273_s12 = smov [#allocation2]   ;;  %s177_s16 = scalar_lea.hbm %s347_s0, 256 }
   0x4   :  { %s24_s13 = sshll.u32 %s273_s12, 4  ;;  %p178_p0 = scmp.ne.s32.totalorder %s347_s0, %s177_s16  ;;  %s25_s13 = int_to_ptr.vmem [resolvable:$true] %s24_s13 }
   0x5   :  { %p181_p1 = scmp.lt.u32.totalorder %s177_s16, %s347_s0 }
   0x7   :  { %p183_p2 = pnand %p181_p1, %p178_p0 }
   0x9   :  { %186 = shalt.err (!%p183_p2)
}
   0xa   :  { %s187_s21 = scalar_lea.vmem %s25_s13, 256  ;;  %p192_p4 = scmp.lt.s32.totalorder %s25_s13, %s25_s13 }
   0xb   :  { %p188_p3 = scmp.ne.s32.totalorder %s25_s13, %s187_s21  ;;  %p193_p5 = scmp.lt.s32.totalorder %s187_s21, %s187_s21 }
   0xd   :  { %p194_p6 = por %p193_p5, %p192_p4 }
   0xf   :  { %p195_p7 = pnand %p194_p6, %p188_p3 }
  0x11   :  { %198 = shalt.err (!%p195_p7)
}
  0x12   :  { %s274_s22 = smov 128   ;;  %s275_s23 = smov 8  }
  0x13   :  { %30 = dma.hbm_to_vmem [thread:$0]  %s347_s0, 256, %s25_s13, [#allocation3], %s274_s22, %s274_s22, %s275_s23  }
  0x14   :  { %s276_s26 = smov [#allocation5]   ;;  %s199_s30 = scalar_lea.hbm %s348_s1, 256 }
  0x15   :  { %s42_s27 = sshll.u32 %s276_s26, 4  ;;  %p200_p8 = scmp.ne.s32.totalorder %s348_s1, %s199_s30  ;;  %s43_s27 = int_to_ptr.vmem [resolvable:$true] %s42_s27 }
  0x16   :  { %p203_p9 = scmp.lt.u32.totalorder %s199_s30, %s348_s1 }
  0x18   :  { %p205_p10 = pnand %p203_p9, %p200_p8 }
  0x1a   :  { %208 = shalt.err (!%p205_p10)
}
  0x1b   :  { %s209_s8 = scalar_lea.vmem %s43_s27, 256  ;;  %p214_p12 = scmp.lt.s32.totalorder %s43_s27, %s43_s27 }
  0x1c   :  { %p210_p11 = scmp.ne.s32.totalorder %s43_s27, %s209_s8  ;;  %p215_p13 = scmp.lt.s32.totalorder %s209_s8, %s209_s8 }
  0x1e   :  { %p216_p0 = por %p215_p13, %p214_p12 }
  0x20   :  { %p217_p1 = pnand %p216_p0, %p210_p11 }
  0x22   :  { %220 = shalt.err (!%p217_p1)
}
  0x23   :  { %48 = dma.hbm_to_vmem [thread:$0]  %s348_s1, 256, %s43_s27, [#allocation6], %s274_s22, %s274_s22, %s275_s23  }
  0x24   :  { %265 = dma.done.wait [#allocation3], 256  }
  0x25   :  { %266 = vsyncadd [#allocation3], 4294967040 }
  0x26   :  { %267 = dma.done.wait [#allocation6], 256  }
  0x27   :  { %268 = vsyncadd [#allocation6], 4294967040  ;;  %v69_v0 = vld [vmem:[#allocation2] sm:$0xff]  ;;  %v70_v1 = vld [vmem:[#allocation2 + $0x8] sm:$0xff]  ;;  %s277_s1 = smov [#allocation7]   ;;  %s278_s11 = smov [#allocation8]  }
  0x28   :  { %v73_v2 = vmul.f32 0.5, %v69_v0  ;;  %v74_v3 = vmul.f32 0.5, %v70_v1  ;;  %v71_v7 = vld [vmem:[#allocation5] sm:$0xff]  ;;  %v72_v9 = vld [vmem:[#allocation5 + $0x8] sm:$0xff]  ;;  %s138_s10 = sshll.u32 %s277_s1, 4  ;;  %s148_s12 = sshll.u32 %s278_s11, 4  ;;  %s139_s10 = int_to_ptr.vmem [resolvable:$true] %s138_s10  ;;  %s149_s12 = int_to_ptr.vmem [resolvable:$true] %s148_s12 }
  0x29   :  { %s221_s13 = scalar_lea.vmem %s139_s10, 128  ;;  %p226_p3 = scmp.lt.s32.totalorder %s139_s10, %s139_s10 }
  0x2a   :  { %173 = vtanh.f32 %v73_v2  ;;  %p222_p2 = scmp.ne.s32.totalorder %s139_s10, %s221_s13  ;;  %p227_p4 = scmp.lt.s32.totalorder %s221_s13, %s221_s13 }
  0x2b   :  { %175 = vtanh.f32 %v74_v3 }
  0x2c   :  { %p228_p5 = por %p227_p4, %p226_p3 }
  0x2e   :  { %p229_p6 = pnand %p228_p5, %p222_p2 }
  0x34   :  { %v174_v4 = vpop.eup %173 }
  0x35   :  { %v176_v5 = vpop.eup %175  ;;  %v77_v6 = vmul.f32 0.5, %v174_v4 }
  0x36   :  { %v78_v8 = vmul.f32 0.5, %v176_v5 }
  0x37   :  { %v79_v10 = vadd.f32 0.5, %v77_v6 }
  0x38   :  { %v80_v11 = vadd.f32 0.5, %v78_v8 }
  0x39   :  { %v90_v12 = vmul.f32 %v79_v10, %v71_v7  ;;  %v96_v13 = vadd.f32 %v79_v10, %v71_v7 }
  0x3a   :  { %v91_v14 = vmul.f32 %v80_v11, %v72_v9  ;;  %v97_v15 = vadd.f32 %v80_v11, %v72_v9 }
  0x3c   :  { %v92_v16 = vadd.f32 %v91_v14, %v90_v12  ;;  %v98_v17 = vadd.f32 %v97_v15, %v96_v13 }
  0x3e   :  { %94 = vst [vmem:[#allocation7] sm:$0xff] %v92_v16  ;;  %100 = vst [vmem:[#allocation8] sm:$0xff] %v98_v17 }
  0x3f   :  { %232 = shalt.err (!%p229_p6)
}
  0x40   :  { %s233_s16 = scalar_lea.hbm %s349_s2, 128 }
  0x41   :  { %p234_p7 = scmp.ne.s32.totalorder %s349_s2, %s233_s16  ;;  %p237_p8 = scmp.lt.u32.totalorder %s233_s16, %s349_s2 }
  0x43   :  { %p239_p9 = pnand %p237_p8, %p234_p7 }
  0x45   :  { %242 = shalt.err (!%p239_p9)
}
  0x46   :  { %141 = dma.vmem_to_hbm [thread:$0]  %s139_s10, 128, %s349_s2, [#allocation4]  }
  0x47   :  { %s243_s23 = scalar_lea.vmem %s149_s12, 128  ;;  %p248_p11 = scmp.lt.s32.totalorder %s149_s12, %s149_s12 }
  0x48   :  { %p244_p10 = scmp.ne.s32.totalorder %s149_s12, %s243_s23  ;;  %p249_p12 = scmp.lt.s32.totalorder %s243_s23, %s243_s23 }
  0x4a   :  { %p250_p13 = por %p249_p12, %p248_p11 }
  0x4c   :  { %p251_p0 = pnand %p250_p13, %p244_p10 }
  0x4e   :  { %254 = shalt.err (!%p251_p0)
}
  0x4f   :  { %s255_s26 = scalar_lea.hbm %s350_s3, 128 }
  0x50   :  { %p256_p1 = scmp.ne.s32.totalorder %s350_s3, %s255_s26  ;;  %p259_p2 = scmp.lt.u32.totalorder %s255_s26, %s350_s3 }
  0x52   :  { %p261_p3 = pnand %p259_p2, %p256_p1 }
  0x54   :  { %264 = shalt.err (!%p261_p3)
}
  0x55   :  { %151 = dma.vmem_to_hbm [thread:$0]  %s149_s12, 128, %s350_s3, [#allocation9]  }
  0x56   :  { %269 = dma.done.wait [#allocation4], 128  }
  0x57   :  { %270 = vsyncadd [#allocation4], 4294967168 }
  0x58   :  { %271 = dma.done.wait [#allocation9], 128  }
  0x59   :  { %272 = vsyncadd [#allocation9], 4294967168 }
  0x5a   :  { %158 = vsyncpa [#allocation3], 1 }
  0x5b   :  { %159 = vsyncpa [#allocation6], 1 }
  0x5c   :  { %160 = vsyncpa [#allocation4], 1 }
  0x5d   :  { %161 = vsyncpa [#allocation9], 1 }

</bundles_post_ra>
